<compile_context>
chip_gen: v6e
topology: v6e:2x2x1
jax: 0.10.0
libtpu: 0.0.40
codegen_flags: <defaults>
</compile_context>

<pallas_src>
import math

import jax
import jax.numpy as jnp
from jax.experimental import pallas as pl
from jax.experimental.pallas import tpu as pltpu

B, S, H = 2, 8, 32           # batch, sequence, hidden
NUM_HEADS, HEAD_DIM = 2, 16  # H == NUM_HEADS * HEAD_DIM
FFN = 64
NUM_LABELS = 2
OUT_LANES = 128              # lane-padded kernel output width


def _mxu(eq, a, b):
    """MXU matmul: bf16 operands, f32 accumulation."""
    return jnp.einsum(eq, a.astype(jnp.bfloat16), b.astype(jnp.bfloat16),
                      preferred_element_type=jnp.float32)


def _layernorm(x, gamma, beta, eps=1e-5):
    mu = jnp.mean(x, axis=-1, keepdims=True)
    var = jnp.mean((x - mu) ** 2, axis=-1, keepdims=True)
    return (x - mu) * jax.lax.rsqrt(var + eps) * gamma + beta


def _gelu(x):
    # tanh approximation of GELU (VPU/EUP friendly)
    return 0.5 * x * (1.0 + jnp.tanh(0.7978845608028654 * (x + 0.044715 * x * x * x)))


def _forward_math(x, mask, w_attn, w_misc, vec, *, approx_recip):
    """Shared math for the Pallas kernel body and the pure-JAX reference.

    x      : [B, S, H]  f32
    mask   : [B, S]     f32 (1 = keep, 0 = masked)
    w_attn : [H, 4H]    bf16  = [wq | wk | wv | wo]
    w_misc : [H+FFN+H, FFN] bf16: rows 0:H w1, rows H:H+FFN (cols :H) w2,
             rows H+FFN: (cols :NUM_LABELS) wc
    vec    : [8, 128]   f32 bias/scale slab (see pack_params)
    Returns logits[:, 0:1] of shape [B, 1].
    """
    # ---- unpack packed parameter slabs (static slices, zero-cost views) ----
    w_qkv = w_attn[:, :3 * H]                    # (H, 3H)
    w_o = w_attn[:, 3 * H:]                      # (H, H)
    w1 = w_misc[:H, :]                           # (H, FFN)
    w2 = w_misc[H:H + FFN, :H]                   # (FFN, H)
    wc = w_misc[H + FFN:, :NUM_LABELS]           # (H, NUM_LABELS)

    b_qkv = vec[0:1, :3 * H]                     # (1, 3H)
    b_o = vec[0:1, 3 * H:4 * H]                  # (1, H)
    g1, be1 = vec[1:2, 0:H], vec[1:2, H:2 * H]
    g2, be2 = vec[1:2, 2 * H:3 * H], vec[1:2, 3 * H:4 * H]
    b1 = vec[2:3, 0:FFN]                         # (1, FFN)
    b2 = vec[2:3, FFN:FFN + H]                   # (1, H)
    bc = vec[2:3, FFN + H:FFN + H + NUM_LABELS]  # (1, NUM_LABELS)

    # ---- attention ---------------------------------------------------------
    bias = (1.0 - mask)[:, None, :] * (-1e9)     # [B, 1, S] additive mask

    # single fused lane-dense projection: one MXU matmul for q|k|v
    qkv = _mxu('bsh,hd->bsd', x, w_qkv) + b_qkv  # [B, S, 3H] f32

    scale = 1.0 / math.sqrt(HEAD_DIM)
    attn = None
    for h in range(NUM_HEADS):                   # NUM_HEADS == 2, static unroll
        q_h = qkv[:, :, h * HEAD_DIM:(h + 1) * HEAD_DIM]
        k_h = qkv[:, :, H + h * HEAD_DIM:H + (h + 1) * HEAD_DIM]
        v_h = qkv[:, :, 2 * H + h * HEAD_DIM:2 * H + (h + 1) * HEAD_DIM]
        s = _mxu('bqd,bkd->bqk', q_h, k_h) * scale + bias   # [B, S, S] f32
        m = jnp.max(s, axis=-1, keepdims=True)
        p = jnp.exp(s - m)
        denom = jnp.sum(p, axis=-1, keepdims=True)
        if approx_recip:
            p = p * pl.reciprocal(denom, approx=True)       # EUP slot
        else:
            p = p / denom
        ctx = _mxu('bqk,bkd->bqd', p, v_h)                  # [B, S, HD]
        # fold output projection per head -> avoids the head-concat relayout
        proj = _mxu('bsd,dh->bsh', ctx,
                    w_o[h * HEAD_DIM:(h + 1) * HEAD_DIM, :])  # [B, S, H]
        attn = proj if attn is None else attn + proj
    attn = attn + b_o

    # ---- residual + layernorm + FFN ---------------------------------------
    h1 = _layernorm(x + attn, g1, be1)
    ff = _gelu(_mxu('bsh,hf->bsf', h1, w1) + b1)
    ff = _mxu('bsf,fh->bsh', ff, w2) + b2
    h2 = _layernorm(h1 + ff, g2, be2)

    # ---- CLS pooling + classifier; only logits[:, 0] is needed -------------
    cls = h2[:, 0, :]                                        # [B, H]
    logits = _mxu('bh,hc->bc', cls, wc) + bc                 # [B, NUM_LABELS]
    return logits[:, 0:1]                                    # [B, 1]


def model_kernel(x_ref, mask_ref, w_attn_ref, w_misc_ref, vec_ref, out_ref):
    logit0 = _forward_math(x_ref[...], mask_ref[...],
                           w_attn_ref[...], w_misc_ref[...], vec_ref[...],
                           approx_recip=True)                # [B, 1]
    # lane-padded store (unmasked lanes); column 0 is the real output
    out_ref[...] = jnp.broadcast_to(logit0, (B, OUT_LANES))


def init_params(key):
    ks = jax.random.split(key, 18)

    def w(k, shape, scale=0.05):
        return jax.random.normal(k, shape, jnp.float32) * scale

    return dict(
        wq=w(ks[0], (H, H)), bq=w(ks[1], (H,), 0.02),
        wk=w(ks[2], (H, H)), bk=w(ks[3], (H,), 0.02),
        wv=w(ks[4], (H, H)), bv=w(ks[5], (H,), 0.02),
        wo=w(ks[6], (H, H)), bo=w(ks[7], (H,), 0.02),
        g1=1.0 + w(ks[8], (H,), 0.02), be1=w(ks[9], (H,), 0.02),
        w1=w(ks[10], (H, FFN)), b1=w(ks[11], (FFN,), 0.02),
        w2=w(ks[12], (FFN, H)), b2=w(ks[13], (H,), 0.02),
        g2=1.0 + w(ks[14], (H,), 0.02), be2=w(ks[15], (H,), 0.02),
        wc=w(ks[16], (H, NUM_LABELS)), bc=w(ks[17], (NUM_LABELS,), 0.02),
    )


def pack_params(p):
    """Pack 18 small parameter tensors into 3 DMA-friendly slabs."""
    # (H, 4H) = (32, 128): lane-dense fused attention weights, bf16 for the MXU
    w_attn = jnp.concatenate(
        [p['wq'], p['wk'], p['wv'], p['wo']], axis=1).astype(jnp.bfloat16)

    # (H+FFN+H, FFN) = (128, 64): w1 / w2 / wc stacked, bf16
    w_misc = jnp.zeros((H + FFN + H, FFN), jnp.float32)
    w_misc = w_misc.at[:H, :].set(p['w1'])
    w_misc = w_misc.at[H:H + FFN, :H].set(p['w2'])
    w_misc = w_misc.at[H + FFN:, :NUM_LABELS].set(p['wc'])
    w_misc = w_misc.astype(jnp.bfloat16)

    # (8, 128) f32: every bias / layernorm scale in one slab
    vec = jnp.zeros((8, 128), jnp.float32)
    vec = vec.at[0, 0:H].set(p['bq'])
    vec = vec.at[0, H:2 * H].set(p['bk'])
    vec = vec.at[0, 2 * H:3 * H].set(p['bv'])
    vec = vec.at[0, 3 * H:4 * H].set(p['bo'])
    vec = vec.at[1, 0:H].set(p['g1'])
    vec = vec.at[1, H:2 * H].set(p['be1'])
    vec = vec.at[1, 2 * H:3 * H].set(p['g2'])
    vec = vec.at[1, 3 * H:4 * H].set(p['be2'])
    vec = vec.at[2, 0:FFN].set(p['b1'])
    vec = vec.at[2, FFN:FFN + H].set(p['b2'])
    vec = vec.at[2, FFN + H:FFN + H + NUM_LABELS].set(p['bc'])
    return w_attn, w_misc, vec


# rough cost hints (see review): lets XLA schedule the tiny custom call sanely
_FLOPS = (2 * B * S * H * (3 * H)                        # fused QKV projection
          + NUM_HEADS * (2 * B * S * S * HEAD_DIM * 2    # scores + context
                         + 2 * B * S * HEAD_DIM * H)     # per-head out-proj
          + 2 * 2 * B * S * H * FFN                      # FFN up + down
          + 2 * B * H * NUM_LABELS)                      # classifier
_TRANSCENDENTALS = B * NUM_HEADS * S * S + B * S * FFN + 4 * B * S


def model_wrapper_forward(embeddings, attention_mask, packed):
    """Pallas equivalent of ModelWrapper.forward -> logits[:, 0] of shape [B]."""
    w_attn, w_misc, vec = packed
    args = (embeddings.astype(jnp.float32),
            attention_mask.astype(jnp.float32),
            w_attn, w_misc, vec)
    bytes_accessed = int(sum(a.size * a.dtype.itemsize for a in args)
                         + B * OUT_LANES * 4)
    vmem = pl.BlockSpec(memory_space=pltpu.MemorySpace.VMEM)
    out = pl.pallas_call(
        model_kernel,
        out_shape=jax.ShapeDtypeStruct((B, OUT_LANES), jnp.float32),
        in_specs=[vmem] * len(args),
        out_specs=vmem,
        cost_estimate=pl.CostEstimate(
            flops=int(_FLOPS),
            transcendentals=int(_TRANSCENDENTALS),
            bytes_accessed=bytes_accessed),
    )(*args)
    return out[:, 0]  # == outputs.logits[:, 0]


def reference_forward(embeddings, attention_mask, packed):
    w_attn, w_misc, vec = packed
    logit0 = _forward_math(embeddings.astype(jnp.float32),
                           attention_mask.astype(jnp.float32),
                           w_attn, w_misc, vec, approx_recip=False)
    return logit0[:, 0]


if __name__ == "__main__":
    key = jax.random.PRNGKey(0)
    k_emb, k_param = jax.random.split(key)

    embeddings = jax.random.normal(k_emb, (B, S, H), jnp.float32)
    # first example fully attended, second example has last 3 tokens masked out
    attention_mask = jnp.array(
        [[1] * S, [1] * (S - 3) + [0] * 3], dtype=jnp.float32)

    params = init_params(k_param)
    packed = pack_params(params)

    out = jax.block_until_ready(
        model_wrapper_forward(embeddings, attention_mask, packed))
    ref = jax.block_until_ready(
        reference_forward(embeddings, attention_mask, packed))

    assert out.shape == (B,), out.shape
    # kernel uses approx reciprocal in softmax; reference uses exact divide
    assert jnp.allclose(out, ref, rtol=1e-2, atol=1e-2), (out, ref)

    print("KERNEL_OK")
</pallas_src>

<mosaic_0001>
module attributes {stable_mosaic.version = 11 : i64} {
  func.func @model_kernel(%arg0: memref<2x8x32xf32, #tpu.memory_space<vmem>>, %arg1: memref<2x8xf32, #tpu.memory_space<vmem>>, %arg2: memref<32x128xbf16, #tpu.memory_space<vmem>>, %arg3: memref<128x64xbf16, #tpu.memory_space<vmem>>, %arg4: memref<8x128xf32, #tpu.memory_space<vmem>>, %arg5: memref<2x128xf32, #tpu.memory_space<vmem>>) attributes {dimension_semantics = [], scalar_prefetch = 0 : i64, scratch_operands = 0 : i64, tpu.core_type = #tpu.core_type<tc>} {
    %c0 = arith.constant 0 : index
    %c0_0 = arith.constant 0 : index
    %c0_1 = arith.constant 0 : index
    %0 = vector.load %arg0[%c0, %c0_0, %c0_1] : memref<2x8x32xf32, #tpu.memory_space<vmem>>, vector<2x8x32xf32>
    %c0_2 = arith.constant 0 : index
    %c0_3 = arith.constant 0 : index
    %1 = vector.load %arg1[%c0_2, %c0_3] : memref<2x8xf32, #tpu.memory_space<vmem>>, vector<2x8xf32>
    %c0_4 = arith.constant 0 : index
    %c0_5 = arith.constant 0 : index
    %2 = vector.load %arg2[%c0_4, %c0_5] : memref<32x128xbf16, #tpu.memory_space<vmem>>, vector<32x128xbf16>
    %c0_6 = arith.constant 0 : index
    %c0_7 = arith.constant 0 : index
    %3 = vector.load %arg3[%c0_6, %c0_7] : memref<128x64xbf16, #tpu.memory_space<vmem>>, vector<128x64xbf16>
    %c0_8 = arith.constant 0 : index
    %c0_9 = arith.constant 0 : index
    %4 = vector.load %arg4[%c0_8, %c0_9] : memref<8x128xf32, #tpu.memory_space<vmem>>, vector<8x128xf32>
    %5 = vector.extract_strided_slice %2 {offsets = [0, 0], sizes = [32, 96], strides = [1, 1]} : vector<32x128xbf16> to vector<32x96xbf16>
    %6 = vector.extract_strided_slice %2 {offsets = [0, 96], sizes = [32, 32], strides = [1, 1]} : vector<32x128xbf16> to vector<32x32xbf16>
    %7 = vector.extract_strided_slice %3 {offsets = [0, 0], sizes = [32, 64], strides = [1, 1]} : vector<128x64xbf16> to vector<32x64xbf16>
    %8 = vector.extract_strided_slice %3 {offsets = [32, 0], sizes = [64, 32], strides = [1, 1]} : vector<128x64xbf16> to vector<64x32xbf16>
    %9 = vector.extract_strided_slice %3 {offsets = [96, 0], sizes = [32, 2], strides = [1, 1]} : vector<128x64xbf16> to vector<32x2xbf16>
    %10 = vector.extract_strided_slice %4 {offsets = [0, 0], sizes = [1, 96], strides = [1, 1]} : vector<8x128xf32> to vector<1x96xf32>
    %11 = vector.extract_strided_slice %4 {offsets = [0, 96], sizes = [1, 32], strides = [1, 1]} : vector<8x128xf32> to vector<1x32xf32>
    %12 = vector.extract_strided_slice %4 {offsets = [1, 0], sizes = [1, 32], strides = [1, 1]} : vector<8x128xf32> to vector<1x32xf32>
    %13 = vector.extract_strided_slice %4 {offsets = [1, 32], sizes = [1, 32], strides = [1, 1]} : vector<8x128xf32> to vector<1x32xf32>
    %14 = vector.extract_strided_slice %4 {offsets = [1, 64], sizes = [1, 32], strides = [1, 1]} : vector<8x128xf32> to vector<1x32xf32>
    %15 = vector.extract_strided_slice %4 {offsets = [1, 96], sizes = [1, 32], strides = [1, 1]} : vector<8x128xf32> to vector<1x32xf32>
    %16 = vector.extract_strided_slice %4 {offsets = [2, 0], sizes = [1, 64], strides = [1, 1]} : vector<8x128xf32> to vector<1x64xf32>
    %17 = vector.extract_strided_slice %4 {offsets = [2, 64], sizes = [1, 32], strides = [1, 1]} : vector<8x128xf32> to vector<1x32xf32>
    %18 = vector.extract_strided_slice %4 {offsets = [2, 96], sizes = [1, 2], strides = [1, 1]} : vector<8x128xf32> to vector<1x2xf32>
    %cst = arith.constant 1.000000e+00 : f32
    %19 = vector.broadcast %cst : f32 to vector<2x8xf32>
    %20 = arith.subf %19, %1 : vector<2x8xf32>
    %21 = vector.shape_cast %20 : vector<2x8xf32> to vector<2x1x8xf32>
    %cst_10 = arith.constant -1.000000e+09 : f32
    %22 = vector.broadcast %cst_10 : f32 to vector<2x1x8xf32>
    %23 = arith.mulf %21, %22 : vector<2x1x8xf32>
    %24 = arith.truncf %0 : vector<2x8x32xf32> to vector<2x8x32xbf16>
    "tpu.trace_start"() <{level = 10 : i32, message = "bsh,hd->bsd"}> : () -> ()
    %cst_11 = arith.constant dense<0.000000e+00> : vector<2x8x96xf32>
    %25 = tpu.matmul %24, %5, %cst_11 {dimension_numbers = #tpu.dot_dimension_numbers<[2], [0], [0, 1], [1], [0, 0, 0, 1, 1, 1], [], []>} : vector<2x8x32xbf16>, vector<32x96xbf16>, vector<2x8x96xf32> -> vector<2x8x96xf32>
    "tpu.trace_stop"() : () -> ()
    %26 = vector.shape_cast %10 : vector<1x96xf32> to vector<1x1x96xf32>
    %27 = vector.broadcast %26 : vector<1x1x96xf32> to vector<2x8x96xf32>
    %28 = arith.addf %25, %27 : vector<2x8x96xf32>
    %29 = vector.extract_strided_slice %28 {offsets = [0, 0, 0], sizes = [2, 8, 16], strides = [1, 1, 1]} : vector<2x8x96xf32> to vector<2x8x16xf32>
    %30 = vector.extract_strided_slice %28 {offsets = [0, 0, 32], sizes = [2, 8, 16], strides = [1, 1, 1]} : vector<2x8x96xf32> to vector<2x8x16xf32>
    %31 = vector.extract_strided_slice %28 {offsets = [0, 0, 64], sizes = [2, 8, 16], strides = [1, 1, 1]} : vector<2x8x96xf32> to vector<2x8x16xf32>
    %32 = arith.truncf %29 : vector<2x8x16xf32> to vector<2x8x16xbf16>
    %33 = arith.truncf %30 : vector<2x8x16xf32> to vector<2x8x16xbf16>
    "tpu.trace_start"() <{level = 10 : i32, message = "bqd,bkd->bqk"}> : () -> ()
    %cst_12 = arith.constant dense<0.000000e+00> : vector<2x8x8xf32>
    %34 = tpu.matmul %32, %33, %cst_12 {dimension_numbers = #tpu.dot_dimension_numbers<[2], [2], [1], [1], [0, 0, 0, 1, 1, 1], [0], [0]>} : vector<2x8x16xbf16>, vector<2x8x16xbf16>, vector<2x8x8xf32> -> vector<2x8x8xf32>
    "tpu.trace_stop"() : () -> ()
    %cst_13 = arith.constant 2.500000e-01 : f32
    %35 = vector.broadcast %cst_13 : f32 to vector<2x8x8xf32>
    %36 = arith.mulf %34, %35 : vector<2x8x8xf32>
    %37 = vector.broadcast %23 : vector<2x1x8xf32> to vector<2x8x8xf32>
    %38 = arith.addf %36, %37 : vector<2x8x8xf32>
    %cst_14 = arith.constant dense<0xFF800000> : vector<2x8xf32>
    %39 = vector.multi_reduction <maximumf>, %38, %cst_14 [2] : vector<2x8x8xf32> to vector<2x8xf32>
    %40 = vector.shape_cast %39 : vector<2x8xf32> to vector<2x8x1xf32>
    %41 = vector.broadcast %40 : vector<2x8x1xf32> to vector<2x8x8xf32>
    %42 = arith.subf %38, %41 : vector<2x8x8xf32>
    %43 = math.exp %42 : vector<2x8x8xf32>
    %cst_15 = arith.constant dense<0.000000e+00> : vector<2x8xf32>
    %44 = vector.multi_reduction <add>, %43, %cst_15 [2] : vector<2x8x8xf32> to vector<2x8xf32>
    %45 = vector.shape_cast %44 : vector<2x8xf32> to vector<2x8x1xf32>
    %46 = tpu.reciprocal %45 {approx = true} : vector<2x8x1xf32> -> vector<2x8x1xf32>
    %47 = vector.broadcast %46 : vector<2x8x1xf32> to vector<2x8x8xf32>
    %48 = arith.mulf %43, %47 : vector<2x8x8xf32>
    %49 = arith.truncf %48 : vector<2x8x8xf32> to vector<2x8x8xbf16>
    %50 = arith.truncf %31 : vector<2x8x16xf32> to vector<2x8x16xbf16>
    "tpu.trace_start"() <{level = 10 : i32, message = "bqk,bkd->bqd"}> : () -> ()
    %cst_16 = arith.constant dense<0.000000e+00> : vector<2x8x16xf32>
    %51 = tpu.matmul %49, %50, %cst_16 {dimension_numbers = #tpu.dot_dimension_numbers<[2], [1], [1], [2], [0, 0, 0, 1, 1, 2], [0], [0]>} : vector<2x8x8xbf16>, vector<2x8x16xbf16>, vector<2x8x16xf32> -> vector<2x8x16xf32>
    "tpu.trace_stop"() : () -> ()
    %52 = vector.extract_strided_slice %6 {offsets = [0, 0], sizes = [16, 32], strides = [1, 1]} : vector<32x32xbf16> to vector<16x32xbf16>
    %53 = arith.truncf %51 : vector<2x8x16xf32> to vector<2x8x16xbf16>
    "tpu.trace_start"() <{level = 10 : i32, message = "bsd,dh->bsh"}> : () -> ()
    %cst_17 = arith.constant dense<0.000000e+00> : vector<2x8x32xf32>
    %54 = tpu.matmul %53, %52, %cst_17 {dimension_numbers = #tpu.dot_dimension_numbers<[2], [0], [0, 1], [1], [0, 0, 0, 1, 1, 1], [], []>} : vector<2x8x16xbf16>, vector<16x32xbf16>, vector<2x8x32xf32> -> vector<2x8x32xf32>
    "tpu.trace_stop"() : () -> ()
    %55 = vector.extract_strided_slice %28 {offsets = [0, 0, 16], sizes = [2, 8, 16], strides = [1, 1, 1]} : vector<2x8x96xf32> to vector<2x8x16xf32>
    %56 = vector.extract_strided_slice %28 {offsets = [0, 0, 48], sizes = [2, 8, 16], strides = [1, 1, 1]} : vector<2x8x96xf32> to vector<2x8x16xf32>
    %57 = vector.extract_strided_slice %28 {offsets = [0, 0, 80], sizes = [2, 8, 16], strides = [1, 1, 1]} : vector<2x8x96xf32> to vector<2x8x16xf32>
    %58 = arith.truncf %55 : vector<2x8x16xf32> to vector<2x8x16xbf16>
    %59 = arith.truncf %56 : vector<2x8x16xf32> to vector<2x8x16xbf16>
    "tpu.trace_start"() <{level = 10 : i32, message = "bqd,bkd->bqk"}> : () -> ()
    %cst_18 = arith.constant dense<0.000000e+00> : vector<2x8x8xf32>
    %60 = tpu.matmul %58, %59, %cst_18 {dimension_numbers = #tpu.dot_dimension_numbers<[2], [2], [1], [1], [0, 0, 0, 1, 1, 1], [0], [0]>} : vector<2x8x16xbf16>, vector<2x8x16xbf16>, vector<2x8x8xf32> -> vector<2x8x8xf32>
    "tpu.trace_stop"() : () -> ()
    %cst_19 = arith.constant 2.500000e-01 : f32
    %61 = vector.broadcast %cst_19 : f32 to vector<2x8x8xf32>
    %62 = arith.mulf %60, %61 : vector<2x8x8xf32>
    %63 = vector.broadcast %23 : vector<2x1x8xf32> to vector<2x8x8xf32>
    %64 = arith.addf %62, %63 : vector<2x8x8xf32>
    %cst_20 = arith.constant dense<0xFF800000> : vector<2x8xf32>
    %65 = vector.multi_reduction <maximumf>, %64, %cst_20 [2] : vector<2x8x8xf32> to vector<2x8xf32>
    %66 = vector.shape_cast %65 : vector<2x8xf32> to vector<2x8x1xf32>
    %67 = vector.broadcast %66 : vector<2x8x1xf32> to vector<2x8x8xf32>
    %68 = arith.subf %64, %67 : vector<2x8x8xf32>
    %69 = math.exp %68 : vector<2x8x8xf32>
    %cst_21 = arith.constant dense<0.000000e+00> : vector<2x8xf32>
    %70 = vector.multi_reduction <add>, %69, %cst_21 [2] : vector<2x8x8xf32> to vector<2x8xf32>
    %71 = vector.shape_cast %70 : vector<2x8xf32> to vector<2x8x1xf32>
    %72 = tpu.reciprocal %71 {approx = true} : vector<2x8x1xf32> -> vector<2x8x1xf32>
    %73 = vector.broadcast %72 : vector<2x8x1xf32> to vector<2x8x8xf32>
    %74 = arith.mulf %69, %73 : vector<2x8x8xf32>
    %75 = arith.truncf %74 : vector<2x8x8xf32> to vector<2x8x8xbf16>
    %76 = arith.truncf %57 : vector<2x8x16xf32> to vector<2x8x16xbf16>
    "tpu.trace_start"() <{level = 10 : i32, message = "bqk,bkd->bqd"}> : () -> ()
    %cst_22 = arith.constant dense<0.000000e+00> : vector<2x8x16xf32>
    %77 = tpu.matmul %75, %76, %cst_22 {dimension_numbers = #tpu.dot_dimension_numbers<[2], [1], [1], [2], [0, 0, 0, 1, 1, 2], [0], [0]>} : vector<2x8x8xbf16>, vector<2x8x16xbf16>, vector<2x8x16xf32> -> vector<2x8x16xf32>
    "tpu.trace_stop"() : () -> ()
    %78 = vector.extract_strided_slice %6 {offsets = [16, 0], sizes = [16, 32], strides = [1, 1]} : vector<32x32xbf16> to vector<16x32xbf16>
    %79 = arith.truncf %77 : vector<2x8x16xf32> to vector<2x8x16xbf16>
    "tpu.trace_start"() <{level = 10 : i32, message = "bsd,dh->bsh"}> : () -> ()
    %cst_23 = arith.constant dense<0.000000e+00> : vector<2x8x32xf32>
    %80 = tpu.matmul %79, %78, %cst_23 {dimension_numbers = #tpu.dot_dimension_numbers<[2], [0], [0, 1], [1], [0, 0, 0, 1, 1, 1], [], []>} : vector<2x8x16xbf16>, vector<16x32xbf16>, vector<2x8x32xf32> -> vector<2x8x32xf32>
    "tpu.trace_stop"() : () -> ()
    %81 = arith.addf %54, %80 : vector<2x8x32xf32>
    %82 = vector.shape_cast %11 : vector<1x32xf32> to vector<1x1x32xf32>
    %83 = vector.broadcast %82 : vector<1x1x32xf32> to vector<2x8x32xf32>
    %84 = arith.addf %81, %83 : vector<2x8x32xf32>
    %85 = arith.addf %0, %84 : vector<2x8x32xf32>
    %cst_24 = arith.constant dense<0.000000e+00> : vector<2x8xf32>
    %86 = vector.multi_reduction <add>, %85, %cst_24 [2] : vector<2x8x32xf32> to vector<2x8xf32>
    %87 = vector.shape_cast %86 : vector<2x8xf32> to vector<2x8x1xf32>
    %cst_25 = arith.constant 3.200000e+01 : f32
    %88 = vector.broadcast %cst_25 : f32 to vector<2x8x1xf32>
    %89 = arith.divf %87, %88 : vector<2x8x1xf32>
    %90 = vector.broadcast %89 : vector<2x8x1xf32> to vector<2x8x32xf32>
    %91 = arith.subf %85, %90 : vector<2x8x32xf32>
    %92 = arith.mulf %91, %91 : vector<2x8x32xf32>
    %cst_26 = arith.constant dense<0.000000e+00> : vector<2x8xf32>
    %93 = vector.multi_reduction <add>, %92, %cst_26 [2] : vector<2x8x32xf32> to vector<2x8xf32>
    %94 = vector.shape_cast %93 : vector<2x8xf32> to vector<2x8x1xf32>
    %cst_27 = arith.constant 3.200000e+01 : f32
    %95 = vector.broadcast %cst_27 : f32 to vector<2x8x1xf32>
    %96 = arith.divf %94, %95 : vector<2x8x1xf32>
    %97 = vector.broadcast %89 : vector<2x8x1xf32> to vector<2x8x32xf32>
    %98 = arith.subf %85, %97 : vector<2x8x32xf32>
    %cst_28 = arith.constant 9.99999974E-6 : f32
    %99 = vector.broadcast %cst_28 : f32 to vector<2x8x1xf32>
    %100 = arith.addf %96, %99 : vector<2x8x1xf32>
    %101 = math.rsqrt %100 : vector<2x8x1xf32>
    %102 = vector.broadcast %101 : vector<2x8x1xf32> to vector<2x8x32xf32>
    %103 = arith.mulf %98, %102 : vector<2x8x32xf32>
    %104 = vector.shape_cast %12 : vector<1x32xf32> to vector<1x1x32xf32>
    %105 = vector.broadcast %104 : vector<1x1x32xf32> to vector<2x8x32xf32>
    %106 = arith.mulf %103, %105 : vector<2x8x32xf32>
    %107 = vector.shape_cast %13 : vector<1x32xf32> to vector<1x1x32xf32>
    %108 = vector.broadcast %107 : vector<1x1x32xf32> to vector<2x8x32xf32>
    %109 = arith.addf %106, %108 : vector<2x8x32xf32>
    %110 = arith.truncf %109 : vector<2x8x32xf32> to vector<2x8x32xbf16>
    "tpu.trace_start"() <{level = 10 : i32, message = "bsh,hf->bsf"}> : () -> ()
    %cst_29 = arith.constant dense<0.000000e+00> : vector<2x8x64xf32>
    %111 = tpu.matmul %110, %7, %cst_29 {dimension_numbers = #tpu.dot_dimension_numbers<[2], [0], [0, 1], [1], [0, 0, 0, 1, 1, 1], [], []>} : vector<2x8x32xbf16>, vector<32x64xbf16>, vector<2x8x64xf32> -> vector<2x8x64xf32>
    "tpu.trace_stop"() : () -> ()
    %112 = vector.shape_cast %16 : vector<1x64xf32> to vector<1x1x64xf32>
    %113 = vector.broadcast %112 : vector<1x1x64xf32> to vector<2x8x64xf32>
    %114 = arith.addf %111, %113 : vector<2x8x64xf32>
    %cst_30 = arith.constant 5.000000e-01 : f32
    %115 = vector.broadcast %cst_30 : f32 to vector<2x8x64xf32>
    %116 = arith.mulf %115, %114 : vector<2x8x64xf32>
    %cst_31 = arith.constant 4.471500e-02 : f32
    %117 = vector.broadcast %cst_31 : f32 to vector<2x8x64xf32>
    %118 = arith.mulf %117, %114 : vector<2x8x64xf32>
    %119 = arith.mulf %118, %114 : vector<2x8x64xf32>
    %120 = arith.mulf %119, %114 : vector<2x8x64xf32>
    %121 = arith.addf %114, %120 : vector<2x8x64xf32>
    %cst_32 = arith.constant 0.797884583 : f32
    %122 = vector.broadcast %cst_32 : f32 to vector<2x8x64xf32>
    %123 = arith.mulf %122, %121 : vector<2x8x64xf32>
    %124 = math.tanh %123 : vector<2x8x64xf32>
    %cst_33 = arith.constant 1.000000e+00 : f32
    %125 = vector.broadcast %cst_33 : f32 to vector<2x8x64xf32>
    %126 = arith.addf %125, %124 : vector<2x8x64xf32>
    %127 = arith.mulf %116, %126 : vector<2x8x64xf32>
    %128 = arith.truncf %127 : vector<2x8x64xf32> to vector<2x8x64xbf16>
    "tpu.trace_start"() <{level = 10 : i32, message = "bsf,fh->bsh"}> : () -> ()
    %cst_34 = arith.constant dense<0.000000e+00> : vector<2x8x32xf32>
    %129 = tpu.matmul %128, %8, %cst_34 {dimension_numbers = #tpu.dot_dimension_numbers<[2], [0], [0, 1], [1], [0, 0, 0, 1, 1, 1], [], []>} : vector<2x8x64xbf16>, vector<64x32xbf16>, vector<2x8x32xf32> -> vector<2x8x32xf32>
    "tpu.trace_stop"() : () -> ()
    %130 = vector.shape_cast %17 : vector<1x32xf32> to vector<1x1x32xf32>
    %131 = vector.broadcast %130 : vector<1x1x32xf32> to vector<2x8x32xf32>
    %132 = arith.addf %129, %131 : vector<2x8x32xf32>
    %133 = arith.addf %109, %132 : vector<2x8x32xf32>
    %cst_35 = arith.constant dense<0.000000e+00> : vector<2x8xf32>
    %134 = vector.multi_reduction <add>, %133, %cst_35 [2] : vector<2x8x32xf32> to vector<2x8xf32>
    %135 = vector.shape_cast %134 : vector<2x8xf32> to vector<2x8x1xf32>
    %cst_36 = arith.constant 3.200000e+01 : f32
    %136 = vector.broadcast %cst_36 : f32 to vector<2x8x1xf32>
    %137 = arith.divf %135, %136 : vector<2x8x1xf32>
    %138 = vector.broadcast %137 : vector<2x8x1xf32> to vector<2x8x32xf32>
    %139 = arith.subf %133, %138 : vector<2x8x32xf32>
    %140 = arith.mulf %139, %139 : vector<2x8x32xf32>
    %cst_37 = arith.constant dense<0.000000e+00> : vector<2x8xf32>
    %141 = vector.multi_reduction <add>, %140, %cst_37 [2] : vector<2x8x32xf32> to vector<2x8xf32>
    %142 = vector.shape_cast %141 : vector<2x8xf32> to vector<2x8x1xf32>
    %cst_38 = arith.constant 3.200000e+01 : f32
    %143 = vector.broadcast %cst_38 : f32 to vector<2x8x1xf32>
    %144 = arith.divf %142, %143 : vector<2x8x1xf32>
    %145 = vector.broadcast %137 : vector<2x8x1xf32> to vector<2x8x32xf32>
    %146 = arith.subf %133, %145 : vector<2x8x32xf32>
    %cst_39 = arith.constant 9.99999974E-6 : f32
    %147 = vector.broadcast %cst_39 : f32 to vector<2x8x1xf32>
    %148 = arith.addf %144, %147 : vector<2x8x1xf32>
    %149 = math.rsqrt %148 : vector<2x8x1xf32>
    %150 = vector.broadcast %149 : vector<2x8x1xf32> to vector<2x8x32xf32>
    %151 = arith.mulf %146, %150 : vector<2x8x32xf32>
    %152 = vector.shape_cast %14 : vector<1x32xf32> to vector<1x1x32xf32>
    %153 = vector.broadcast %152 : vector<1x1x32xf32> to vector<2x8x32xf32>
    %154 = arith.mulf %151, %153 : vector<2x8x32xf32>
    %155 = vector.shape_cast %15 : vector<1x32xf32> to vector<1x1x32xf32>
    %156 = vector.broadcast %155 : vector<1x1x32xf32> to vector<2x8x32xf32>
    %157 = arith.addf %154, %156 : vector<2x8x32xf32>
    %158 = vector.extract_strided_slice %157 {offsets = [0, 0, 0], sizes = [2, 1, 32], strides = [1, 1, 1]} : vector<2x8x32xf32> to vector<2x1x32xf32>
    %159 = vector.shape_cast %158 : vector<2x1x32xf32> to vector<2x32xf32>
    %160 = arith.truncf %159 : vector<2x32xf32> to vector<2x32xbf16>
    "tpu.trace_start"() <{level = 10 : i32, message = "bh,hc->bc"}> : () -> ()
    %cst_40 = arith.constant dense<0.000000e+00> : vector<2x2xf32>
    %161 = tpu.matmul %160, %9, %cst_40 {dimension_numbers = #tpu.dot_dimension_numbers<[1], [0], [0], [1], [0, 0, 1, 1], [], []>} : vector<2x32xbf16>, vector<32x2xbf16>, vector<2x2xf32> -> vector<2x2xf32>
    "tpu.trace_stop"() : () -> ()
    %162 = vector.broadcast %18 : vector<1x2xf32> to vector<2x2xf32>
    %163 = arith.addf %161, %162 : vector<2x2xf32>
    %164 = vector.extract_strided_slice %163 {offsets = [0, 0], sizes = [2, 1], strides = [1, 1]} : vector<2x2xf32> to vector<2x1xf32>
    %165 = vector.shape_cast %164 : vector<2x1xf32> to vector<2x1xf32>
    %166 = vector.broadcast %165 : vector<2x1xf32> to vector<2x128xf32>
    %c0_41 = arith.constant 0 : index
    %c0_42 = arith.constant 0 : index
    %167 = vector.load %arg5[%c0_41, %c0_42] : memref<2x128xf32, #tpu.memory_space<vmem>>, vector<2x128xf32>
    tpu.vector_store %arg5[%c0_41, %c0_42], %166 {strides = array<i32>} : memref<2x128xf32, #tpu.memory_space<vmem>>, vector<2x128xf32>,
    return
  }
}

</mosaic_0001>

<bundles_post_ra>
// kernel: tpu_custom_call.1
= control target key start
LH: loop header
LB: loop body
LE: loop exit
PB: predicated region body
PF: predicated region fallthrough
CT: control target
= control target key end

     0   :  { %v1287_v1 = vmov 0.0   ;;  %vm1288_vm0 = vmmov 0   ;;  %vm97_vm1 = vcmask 261120   ;;  %s1548_s0 = inlined_call_operand.vmem [shape: f32[2,8,32], index: 0, kind: input, shape index: {}]   ;;  %s1549_s1 = inlined_call_operand.vmem [shape: f32[2,8], index: 1, kind: input, shape index: {}]   ;;  %s1550_s2 = inlined_call_operand.vmem [shape: bf16[32,128], index: 2, kind: input, shape index: {}]   ;;  %s1551_s3 = inlined_call_operand.vmem [shape: bf16[128,64], index: 3, kind: input, shape index: {}]   ;;  %s1552_s4 = inlined_call_operand.vmem [shape: f32[8,128], index: 4, kind: input, shape index: {}]   ;;  %s1553_s5 = inlined_call_operand.hbm [shape: f32[2,128], index: 5, kind: output, shape index: {}]  }
   0x1   :  { %v1331_v0 = vld [vmem:[%s1550_s2 + $0x8] sm:$0xff]   ;;  %1119 = vmatprep.subr.bf16.mxu0 %v1287_v1  ;;  %1127 = vmatprep.subr.bf16.mxu1 %v1287_v1  ;;  %v1339_v2 = vld [vmem:[%s1550_s2] sm:$0xff]  }
   0x2   :  { %1120 = vmatpush3.bf16.msra.mxu0 %v1331_v0  ;;  %1123 = vmatprep.mubr.msk.bf16.mxu0 %vm1288_vm0, %v1287_v1  ;;  %v1346_v3 = vld [vmem:[%s1548_s0] sm:$0xff]  ;;  %v1351_v4 = vld [vmem:[%s1548_s0 + $0x8] sm:$0xff] }
   0x3   :  { %1121 = vmatprep.subr.bf16.mxu0 %v1287_v1  ;;  %1129 = vmatprep.mubr.msk.bf16.mxu1 %vm1288_vm0, %v1287_v1  ;;  %v1080_v5 = vpack.c.bf16 %v1351_v4, %v1346_v3 }
   0x6   :  { %1122 = vmatpush3.bf16.msra.mxu0 %v1339_v2 }
   0x7   :  { %1133 = vmatprep.subr.bf16.mxu0 %v1287_v1 }
   0x8   :  { %10 = vsyncpa [#allocation3], 0  ;;  %v51_v6 = vlaneseq  ;;  %v1369_v9 = vld [vmem:[%s1552_s4] sm:$0xff]  ;;  %s1289_s26 = smov 96   ;;  %vm147_vm2 = vcmask 130048   ;;  %vm259_vm3 = vcmask 64512  }
   0x9   :  { %1124 = vmatmul.mubr.msk.bf16.vlgmr.msra.gmra.mxu0 %vm97_vm1, %v1080_v5  ;;  %v1290_v23 = vmov 1966171168   ;;  %v24_v26 = vld [vmem:[%s1549_s1] sm:$0x3]  ;;  %s1291_s1 = smov 64   ;;  %s1292_s28 = smov 80  }
   0xa   :  { %1135 = vmatprep.mubr.msk.bf16.mxu0 %vm1288_vm0, %v1287_v1  ;;  %v1363_v7 = vshrl.u32 %v51_v6, 7  ;;  %v49_v24 = vunpack.c.l.s4 %v1290_v23  ;;  %v46_v27 = vsub.f32 1.0, %v24_v26  ;;  %vm289_vm4 = vcmask 1043456   ;;  %s1293_s29 = smov 112   ;;  %s1294_s30 = smov 48  }
   0xb   :  { %s1295_s6 = smov 32   ;;  %vm880_vm5 = vcmask 523264   ;;  %vm970_vm6 = vcmask 1041409  }
   0xc   :  { %v78_v8 = vsub.s32 0, %v1363_v7  ;;  %v50_v25 = vunpack.c.0.s8 %v49_v24 }
   0xe   :  { %v1372_v10 = vrot.slane %v1369_v9, %v78_v8  ;;  %v53_v28 = vsub.s32 %v50_v25, %v1363_v7 }
  0x10   :  { %v54_v29 = vrot.slane %v46_v27, %v53_v28 }
  0x12   :  { %v62_v30 = vrot.slane %v54_v29, %v53_v28  ;;  %v55_v31 = vcombine.high %v54_v29, %v54_v29 }
  0x14   :  { %v72_v32 = vmul.f32 -1e+09, %v62_v30  ;;  %v69_v33 = vrot.slane %v55_v31, %v53_v28 }
  0x16   :  { %v1400_v34 = vrot.slane %v72_v32, %v78_v8  ;;  %v73_v35 = vmul.f32 -1e+09, %v69_v33 }
  0x18   :  { %v1403_v40 = vrot.slane %v73_v35, %v78_v8 }
  0xc9   :  { %v135_v11 = vpop.f32.mrf.mxu0 }
  0xca   :  { %v136_v12 = vadd.f32 %v135_v11, %v1372_v10 }
  0xcb   :  { %v1125_v13 = vpop.f32.mrf.mxu0 }
  0xcc   :  { %v1375_v14 = vpack.c.bf16 %v136_v12, %v136_v12 }
  0xcd   :  { %v138_v15 = vpop.f32.mrf.mxu0 }
  0xce   :  { %v139_v16 = vadd.f32 %v138_v15, %v1372_v10  ;;  %145 = vrot.lane.b32.xlu0 %v1375_v14, %s1289_s26 }
  0xcf   :  { %v1126_v17 = vpop.f32.mrf.mxu0 }
  0xd0   :  { %v1380_v18 = vpack.c.bf16 %v139_v16, %v139_v16 }
  0xd2   :  { %195 = vrot.lane.b32.xlu0 %v1380_v18, %s1289_s26 }
 0x140   :  { %v146_v19 = vpop.permute.xlu0 %145 }
 0x141   :  { %v152_v20 = vsel %vm147_vm2, %v146_v19, 0 }
 0x142   :  { %1128 = vmatpush3.bf16.xpose.msra.mxu1 %v152_v20 }
 0x143   :  { %1139 = vmatprep.subr.bf16.mxu1 %v1287_v1 }
 0x144   :  { %v196_v21 = vpop.permute.xlu0 %195 }
 0x145   :  { %v201_v22 = vsel %vm147_vm2, %v196_v21, 0 }
 0x146   :  { %1134 = vmatpush3.bf16.xpose.msra.mxu0 %v201_v22 }
 0x147   :  { %1145 = vmatprep.subr.bf16.mxu0 %v1287_v1 }
 0x149   :  { %1130 = vmatmul.mubr.msk.bf16.vlgmr.msra.gmra.mxu1 %vm147_vm2, %v1375_v14 }
 0x14a   :  { %1141 = vmatprep.mubr.msk.bf16.mxu1 %vm1288_vm0, %v1287_v1 }
 0x14d   :  { %1136 = vmatmul.mubr.msk.bf16.vlgmr.msra.gmra.mxu0 %vm147_vm2, %v1380_v18 }
 0x14e   :  { %1147 = vmatprep.mubr.msk.bf16.mxu0 %vm1288_vm0, %v1287_v1 }
 0x209   :  { %v188_v36 = vpop.f32.mrf.mxu1 }
 0x20a   :  { %v243_v37 = vmul.f32 0.25, %v188_v36 }
 0x20b   :  { %v1131_v38 = vpop.f32.mrf.mxu1 }
 0x20c   :  { %v257_v39 = vadd.f32 %v1400_v34, %v243_v37 }
 0x20d   :  { %v191_v41 = vpop.f32.mrf.mxu1  ;;  %v237_v42 = vpop.f32.mrf.mxu0 }
 0x20e   :  { %v244_v43 = vmul.f32 0.25, %v237_v42  ;;  %v260_v44 = vsel %vm259_vm3, %v257_v39, -inf }
 0x20f   :  { %261 = vmax.xlane.f32.xlu1 %v260_v44  ;;  %v1132_v45 = vpop.f32.mrf.mxu1  ;;  %v1137_v46 = vpop.f32.mrf.mxu0 }
 0x210   :  { %v258_v47 = vadd.f32 %v1403_v40, %v244_v43 }
 0x211   :  { %v240_v48 = vpop.f32.mrf.mxu0 }
 0x212   :  { %v263_v49 = vsel %vm259_vm3, %v258_v47, -inf }
 0x213   :  { %264 = vmax.xlane.f32.xlu1 %v263_v49  ;;  %v1138_v50 = vpop.f32.mrf.mxu0 }
 0x224   :  { %284 = vrot.lane.b32.xlu1 %v1375_v14, %s1291_s1 }
 0x228   :  { %333 = vrot.lane.b32.xlu1 %v1380_v18, %s1291_s1 }
 0x22c   :  { %385 = vrot.lane.b32.xlu1 %v1375_v14, %s1292_s28 }
 0x298   :  { %v262_v51 = vpop.xlane.xlu1 %261 }
 0x299   :  { %v266_v52 = vsub.f32 %v257_v39, %v262_v51 }
 0x29b   :  { %v268_v53 = vmul.f32 1.442695, %v266_v52 }
 0x29c   :  { %v265_v54 = vpop.xlane.xlu1 %264 }
 0x29d   :  { %1237 = vpow2.f32 %v268_v53  ;;  %v267_v55 = vsub.f32 %v258_v47, %v265_v54 }
 0x29f   :  { %v270_v56 = vmul.f32 1.442695, %v267_v55 }
 0x2a0   :  { %v285_v57 = vpop.permute.xlu1 %284 }
 0x2a1   :  { %1239 = vpow2.f32 %v270_v56  ;;  %v291_v58 = vsel %vm289_vm4, %v285_v57, 0 }
 0x2a2   :  { %1140 = vmatpush3.bf16.msra.mxu1 %v291_v58 }
 0x2a3   :  { %1151 = vmatprep.subr.bf16.mxu1 %v1287_v1 }
 0x2a4   :  { %v334_v59 = vpop.permute.xlu1 %333 }
 0x2a5   :  { %v339_v60 = vsel %vm289_vm4, %v334_v59, 0 }
 0x2a6   :  { %1146 = vmatpush3.bf16.msra.mxu0 %v339_v60 }
 0x2a7   :  { %1157 = vmatprep.subr.bf16.mxu0 %v1287_v1 }
 0x2a8   :  { %v386_v6 = vpop.permute.xlu1 %385 }
 0x2a9   :  { %v391_v17 = vsel %vm147_vm2, %v386_v6, 0 }
 0x2aa   :  { %v1238_v61 = vpop.eup %1237 }
 0x2ab   :  { %v272_v62 = vsel %vm259_vm3, %v1238_v61, 0.0 }
 0x2ac   :  { %273 = vadd.xlane.f32.xlu0 %v272_v62 }
 0x2ae   :  { %v1240_v63 = vpop.eup %1239 }
 0x2af   :  { %v275_v5 = vsel %vm259_vm3, %v1240_v63, 0.0 }
 0x2b0   :  { %276 = vadd.xlane.f32.xlu1 %v275_v5 }
 0x2c1   :  { %435 = vrot.lane.b32.xlu1 %v1380_v18, %s1292_s28 }
 0x2c2   :  { %383 = vrot.lane.b32.xlu0 %v1375_v14, %s1293_s29 }
 0x2c5   :  { %433 = vrot.lane.b32.xlu1 %v1380_v18, %s1293_s29 }
 0x335   :  { %v274_v8 = vpop.xlane.xlu0 %273 }
 0x336   :  { %1241 = vrcp.f32 %v274_v8 }
 0x339   :  { %v277_v11 = vpop.xlane.xlu1 %276  ;;  %v384_v23 = vpop.permute.xlu0 %383 }
 0x33a   :  { %1243 = vrcp.f32 %v277_v11 }
 0x33d   :  { %v436_v20 = vpop.permute.xlu1 %435 }
 0x33e   :  { %v441_v22 = vsel %vm147_vm2, %v436_v20, 0 }
 0x341   :  { %v434_v24 = vpop.permute.xlu1 %433 }
 0x343   :  { %v1242_v12 = vpop.eup %1241 }
 0x344   :  { %v280_v13 = vmul.f32 %v1242_v12, %v1238_v61 }
 0x346   :  { %v282_v15 = vpack.c.bf16 %v280_v13, %v280_v13 }
 0x347   :  { %v1244_v16 = vpop.eup %1243 }
 0x348   :  { %1142 = vmatmul.mubr.msk.bf16.vlgmr.msra.gmra.mxu1 %vm259_vm3, %v282_v15  ;;  %v281_v19 = vmul.f32 %v1244_v16, %v1240_v63 }
 0x349   :  { %1152 = vmatpush3.bf16.xpose.msra.mxu1 %v391_v17  ;;  %1153 = vmatprep.mubr.msk.bf16.mxu1 %vm1288_vm0, %v1287_v1 }
 0x34a   :  { %v283_v21 = vpack.c.bf16 %v281_v19, %v281_v19  ;;  %1163 = vmatprep.subr.bf16.mxu1 %v1287_v1 }
 0x34c   :  { %1148 = vmatmul.mubr.msk.bf16.vlgmr.msra.gmra.mxu0 %vm259_vm3, %v283_v21 }
 0x34d   :  { %1158 = vmatpush3.bf16.xpose.msra.mxu0 %v441_v22  ;;  %1159 = vmatprep.mubr.msk.bf16.mxu0 %vm1288_vm0, %v1287_v1 }
 0x34e   :  { %1169 = vmatprep.subr.bf16.mxu0 %v1287_v1 }
 0x350   :  { %1154 = vmatmul.mubr.msk.bf16.vlgmr.msra.gmra.mxu1 %vm147_vm2, %v384_v23 }
 0x351   :  { %1165 = vmatprep.mubr.msk.bf16.mxu1 %vm1288_vm0, %v1287_v1 }
 0x354   :  { %1160 = vmatmul.mubr.msk.bf16.vlgmr.msra.gmra.mxu0 %vm147_vm2, %v434_v24 }
 0x355   :  { %1171 = vmatprep.mubr.msk.bf16.mxu0 %vm1288_vm0, %v1287_v1 }
 0x408   :  { %v1438_v25 = vpop.f32.mrf.mxu1 }
 0x40a   :  { %v1143_v26 = vpop.f32.mrf.mxu1 }
 0x40c   :  { %v330_v27 = vpop.f32.mrf.mxu1  ;;  %v1440_v28 = vpop.f32.mrf.mxu0 }
 0x40d   :  { %v1082_v29 = vpack.c.bf16 %v1440_v28, %v1438_v25 }
 0x40e   :  { %v1144_v30 = vpop.f32.mrf.mxu1  ;;  %v1149_v31 = vpop.f32.mrf.mxu0 }
 0x410   :  { %v378_v32 = vpop.f32.mrf.mxu0  ;;  %v427_v33 = vpop.f32.mrf.mxu1 }
 0x411   :  { %v483_v35 = vmul.f32 0.25, %v427_v33 }
 0x412   :  { %v1150_v36 = vpop.f32.mrf.mxu0  ;;  %v1155_v37 = vpop.f32.mrf.mxu1 }
 0x413   :  { %v485_v38 = vadd.f32 %v483_v35, %v1400_v34 }
 0x414   :  { %v430_v39 = vpop.f32.mrf.mxu1  ;;  %v477_v41 = vpop.f32.mrf.mxu0 }
 0x415   :  { %v484_v42 = vmul.f32 0.25, %v477_v41  ;;  %v487_v43 = vsel %vm259_vm3, %v485_v38, -inf }
 0x416   :  { %488 = vmax.xlane.f32.xlu1 %v487_v43  ;;  %v1156_v44 = vpop.f32.mrf.mxu1  ;;  %v1161_v45 = vpop.f32.mrf.mxu0 }
 0x417   :  { %v486_v46 = vadd.f32 %v484_v42, %v1403_v40 }
 0x418   :  { %v480_v47 = vpop.f32.mrf.mxu0 }
 0x419   :  { %v490_v48 = vsel %vm259_vm3, %v486_v46, -inf }
 0x41a   :  { %491 = vmax.xlane.f32.xlu0 %v490_v48  ;;  %v1162_v49 = vpop.f32.mrf.mxu0 }
 0x430   :  { %559 = vrot.lane.b32.xlu0 %v1380_v18, %s1294_s30 }
 0x434   :  { %714 = vrot.lane.b32.xlu0 %v1372_v10, %s1295_s6 }
 0x49f   :  { %v489_v34 = vpop.xlane.xlu1 %488 }
 0x4a0   :  { %v493_v50 = vsub.f32 %v485_v38, %v489_v34  ;;  %v750_v34 = vsub.s32 1, %v1363_v7 }
 0x4a2   :  { %v495_v51 = vmul.f32 1.442695, %v493_v50  ;;  %v1229_v50 = vld [vmem:[%s1551_s3 + $0x8] sm:$0xff]  }
 0x4a3   :  { %v492_v52 = vpop.xlane.xlu0 %491 }
 0x4a4   :  { %1245 = vpow2.f32 %v495_v51  ;;  %v494_v53 = vsub.f32 %v486_v46, %v492_v52  ;;  %v1230_v51 = vld [vmem:[%s1551_s3] sm:$0xff]   ;;  %v764_v52 = vsub.s32 2, %v1363_v7 }
 0x4a6   :  { %v497_v54 = vmul.f32 1.442695, %v494_v53  ;;  %v1501_v53 = vrot.slane %v1369_v9, %v764_v52 }
 0x4a7   :  { %v560_v40 = vpop.permute.xlu0 %559 }
 0x4a8   :  { %1247 = vpow2.f32 %v497_v54  ;;  %v565_v55 = vsel %vm289_vm4, %v560_v40, 0 }
 0x4a9   :  { %1170 = vmatpush3.bf16.msra.mxu0 %v565_v55 }
 0x4aa   :  { %1181 = vmatprep.subr.bf16.mxu0 %v1287_v1 }
 0x4ab   :  { %v715_v27 = vpop.permute.xlu0 %714 }
 0x4b1   :  { %v1246_v56 = vpop.eup %1245 }
 0x4b2   :  { %v499_v18 = vsel %vm259_vm3, %v1246_v56, 0.0 }
 0x4b3   :  { %500 = vadd.xlane.f32.xlu1 %v499_v18 }
 0x4b5   :  { %v1248_v57 = vpop.eup %1247 }
 0x4b6   :  { %v502_v10 = vsel %vm259_vm3, %v1248_v57, 0.0 }
 0x4b7   :  { %503 = vadd.xlane.f32.xlu1 %v502_v10 }
 0x4c8   :  { %511 = vrot.lane.b32.xlu1 %v1375_v14, %s1294_s30 }
 0x4cc   :  { %614 = vrot.lane.b32.xlu1 %v1331_v0, %s1295_s6 }
 0x4d0   :  { %666 = vrot.lane.b32.xlu1 %v1339_v2, %s1295_s6 }
 0x53c   :  { %v501_v58 = vpop.xlane.xlu1 %500 }
 0x53d   :  { %1249 = vrcp.f32 %v501_v58 }
 0x540   :  { %v504_v59 = vpop.xlane.xlu1 %503 }
 0x541   :  { %1251 = vrcp.f32 %v504_v59 }
 0x544   :  { %v512_v60 = vpop.permute.xlu1 %511 }
 0x545   :  { %v517_v61 = vsel %vm289_vm4, %v512_v60, 0 }
 0x546   :  { %1164 = vmatpush3.bf16.msra.mxu1 %v517_v61 }
 0x547   :  { %1175 = vmatprep.subr.bf16.mxu1 %v1287_v1 }
 0x548   :  { %v615_v5 = vpop.permute.xlu1 %614 }
 0x54a   :  { %v1250_v62 = vpop.eup %1249 }
 0x54b   :  { %v507_v63 = vmul.f32 %v1250_v62, %v1246_v56 }
 0x54c   :  { %v667_v8 = vpop.permute.xlu1 %666 }
 0x54d   :  { %v509_v14 = vpack.c.bf16 %v507_v63, %v507_v63 }
 0x54e   :  { %v1252_v6 = vpop.eup %1251 }
 0x54f   :  { %1166 = vmatmul.mubr.msk.bf16.vlgmr.msra.gmra.mxu1 %vm259_vm3, %v509_v14  ;;  %v508_v0 = vmul.f32 %v1252_v6, %v1248_v57  ;;  %v1231_v14 = vld [vmem:[%s1551_s3 + $0x28] sm:$0xff]   ;;  %v1232_v6 = vld [vmem:[%s1551_s3 + $0x20] sm:$0xff]  }
 0x550   :  { %1176 = vmatpush3.bf16.msra.mxu1 %v615_v5  ;;  %1177 = vmatprep.mubr.msk.bf16.mxu1 %vm1288_vm0, %v1287_v1 }
 0x551   :  { %v510_v2 = vpack.c.bf16 %v508_v0, %v508_v0  ;;  %1187 = vmatprep.subr.bf16.mxu1 %v1287_v1  ;;  %v1233_v0 = vld [vmem:[%s1551_s3 + $0x18] sm:$0xff]  }
 0x553   :  { %1172 = vmatmul.mubr.msk.bf16.vlgmr.msra.gmra.mxu0 %vm259_vm3, %v510_v2  ;;  %v1234_v2 = vld [vmem:[%s1551_s3 + $0x10] sm:$0xff]  }
 0x554   :  { %1182 = vmatpush3.bf16.msra.mxu0 %v667_v8  ;;  %1183 = vmatprep.mubr.msk.bf16.mxu0 %vm1288_vm0, %v1287_v1 }
 0x555   :  { %1195 = vmatprep.subr.bf16.mxu0 %v1287_v1 }
 0x55b   :  { %1184 = vmatmul.mubr.msk.bf16.vlgmr.msra.gmra.mxu0 %vm147_vm2, %v1082_v29 }
 0x55c   :  { %1203 = vmatprep.mubr.msk.bf16.mxu0 %vm1288_vm0, %v1287_v1  ;;  %1196 = vmatpush3.bf16.msra.mxu0 %v1231_v14 }
 0x55d   :  { %1197 = vmatprep.subr.bf16.mxu0 %v1287_v1 }
 0x560   :  { %1198 = vmatpush3.bf16.msra.mxu0 %v1232_v6 }
 0x561   :  { %1199 = vmatprep.subr.bf16.mxu0 %v1287_v1 }
 0x564   :  { %1200 = vmatpush3.bf16.msra.mxu0 %v1233_v0 }
 0x565   :  { %1201 = vmatprep.subr.bf16.mxu0 %v1287_v1 }
 0x568   :  { %1202 = vmatpush3.bf16.msra.mxu0 %v1234_v2 }
 0x60f   :  { %v553_v11 = vpop.f32.mrf.mxu1 }
 0x611   :  { %v1167_v12 = vpop.f32.mrf.mxu1 }
 0x613   :  { %v556_v13 = vpop.f32.mrf.mxu1  ;;  %v601_v15 = vpop.f32.mrf.mxu0 }
 0x614   :  { %v1081_v16 = vpack.c.bf16 %v601_v15, %v553_v11 }
 0x615   :  { %v1168_v17 = vpop.f32.mrf.mxu1  ;;  %v1173_v19 = vpop.f32.mrf.mxu0 }
 0x616   :  { %1178 = vmatmul.mubr.msk.bf16.vlgmr.msra.gmra.mxu1 %vm147_vm2, %v1081_v16 }
 0x617   :  { %v604_v20 = vpop.f32.mrf.mxu0  ;;  %1191 = vmatprep.mubr.msk.bf16.mxu1 %vm1288_vm0, %v1287_v1  ;;  %1188 = vmatpush3.bf16.msra.mxu1 %v1229_v50 }
 0x618   :  { %1189 = vmatprep.subr.bf16.mxu1 %v1287_v1 }
 0x619   :  { %v1174_v21 = vpop.f32.mrf.mxu0 }
 0x61b   :  { %v706_v22 = vpop.f32.mrf.mxu0  ;;  %1190 = vmatpush3.bf16.msra.mxu1 %v1230_v51 }
 0x61c   :  { %1207 = vmatprep.subr.bf16.mxu1 %v1287_v1 }
 0x61d   :  { %v1185_v23 = vpop.f32.mrf.mxu0 }
 0x61f   :  { %v709_v24 = vpop.f32.mrf.mxu0 }
 0x621   :  { %v1186_v25 = vpop.f32.mrf.mxu0 }
 0x6d6   :  { %v654_v26 = vpop.f32.mrf.mxu1 }
 0x6d7   :  { %v707_v28 = vadd.f32 %v706_v22, %v654_v26 }
 0x6d8   :  { %v1179_v29 = vpop.f32.mrf.mxu1 }
 0x6d9   :  { %v717_v30 = vadd.f32 %v715_v27, %v707_v28 }
 0x6da   :  { %v657_v31 = vpop.f32.mrf.mxu1 }
 0x6db   :  { %v710_v32 = vadd.f32 %v709_v24, %v657_v31  ;;  %v719_v33 = vadd.f32 %v717_v30, %v1346_v3 }
 0x6dc   :  { %v1180_v35 = vpop.f32.mrf.mxu1 }
 0x6dd   :  { %v718_v36 = vadd.f32 %v715_v27, %v710_v32  ;;  %v721_v37 = vsel %vm97_vm1, %v719_v33, 0.0 }
 0x6de   :  { %722 = vadd.xlane.f32.xlu1 %v721_v37 }
 0x6df   :  { %v720_v38 = vadd.f32 %v718_v36, %v1351_v4  ;;  %v1487_v4 = vrot.slane %v1369_v9, %v750_v34 }
 0x6e1   :  { %v724_v39 = vsel %vm97_vm1, %v720_v38, 0.0 }
 0x6e2   :  { %725 = vadd.xlane.f32.xlu0 %v724_v39 }
 0x767   :  { %v723_v41 = vpop.xlane.xlu1 %722 }
 0x768   :  { %v728_v42 = vmul.f32 0.03125, %v723_v41 }
 0x76a   :  { %v730_v43 = vsub.f32 %v719_v33, %v728_v42 }
 0x76b   :  { %v726_v44 = vpop.xlane.xlu0 %725 }
 0x76c   :  { %v729_v45 = vmul.f32 0.03125, %v726_v44  ;;  %v732_v46 = vmul.f32 %v730_v43, %v730_v43 }
 0x76e   :  { %v731_v47 = vsub.f32 %v720_v38, %v729_v45  ;;  %v734_v48 = vsel %vm97_vm1, %v732_v46, 0.0 }
 0x76f   :  { %735 = vadd.xlane.f32.xlu0 %v734_v48 }
 0x770   :  { %v733_v3 = vmul.f32 %v731_v47, %v731_v47 }
 0x772   :  { %v737_v49 = vsel %vm97_vm1, %v733_v3, 0.0 }
 0x773   :  { %738 = vadd.xlane.f32.xlu1 %v737_v49 }
 0x784   :  { %877 = vrot.lane.b32.xlu1 %v1501_v53, %s1291_s1 }
 0x785   :  { %755 = vrot.lane.b32.xlu0 %v1487_v4, %s1289_s26 }
 0x7f8   :  { %v736_v54 = vpop.xlane.xlu0 %735 }
 0x7f9   :  { %v740_v40 = vmul.f32 0.03125, %v736_v54 }
 0x7fb   :  { %v742_v55 = vadd.f32 1e-05, %v740_v40 }
 0x7fc   :  { %v739_v56 = vpop.xlane.xlu1 %738  ;;  %v756_v61 = vpop.permute.xlu0 %755 }
 0x7fd   :  { %1253 = vrsqrt.f32 %v742_v55  ;;  %v741_v18 = vmul.f32 0.03125, %v739_v56 }
 0x7ff   :  { %v743_v57 = vadd.f32 1e-05, %v741_v18 }
 0x800   :  { %v878_v38 = vpop.permute.xlu1 %877 }
 0x801   :  { %1255 = vrsqrt.f32 %v743_v57  ;;  %v1235_v57 = vld [vmem:[%s1551_s3 + $0x38] sm:$0xff]  }
 0x80a   :  { %v1254_v10 = vpop.eup %1253 }
 0x80b   :  { %v746_v58 = vmul.f32 %v1254_v10, %v730_v43  ;;  %v1236_v10 = vld [vmem:[%s1551_s3 + $0x30] sm:$0xff]   ;;  %s1297_s3 = smov [#allocation2]  }
 0x80c   :  { %s1043_s23 = sshll.u32 %s1297_s3, 4  ;;  %s1044_s23 = int_to_ptr.vmem [resolvable:$true] %s1043_s23 }
 0x80d   :  { %v752_v7 = vmul.f32 %v1487_v4, %v746_v58  ;;  %s1265_s24 = scalar_lea.vmem %s1044_s23, 32  ;;  %p1270_p1 = scmp.lt.s32.totalorder %s1044_s23, %s1044_s23 }
 0x80e   :  { %v1256_v59 = vpop.eup %1255  ;;  %p1266_p0 = scmp.ne.s32.totalorder %s1044_s23, %s1265_s24  ;;  %p1271_p2 = scmp.lt.s32.totalorder %s1265_s24, %s1265_s24 }
 0x80f   :  { %v747_v60 = vmul.f32 %v1256_v59, %v731_v47  ;;  %v758_v62 = vadd.f32 %v756_v61, %v752_v7 }
 0x810   :  { %p1272_p3 = por %p1271_p2, %p1270_p1 }
 0x811   :  { %v753_v9 = vmul.f32 %v1487_v4, %v747_v60 }
 0x812   :  { %p1273_p4 = pnand %p1272_p3, %p1266_p0 }
 0x813   :  { %v759_v63 = vadd.f32 %v756_v61, %v753_v9 }
 0x815   :  { %v1083_v5 = vpack.c.bf16 %v759_v63, %v758_v62 }
 0x817   :  { %1192 = vmatmul.mubr.msk.bf16.vlgmr.msra.gmra.mxu1 %vm97_vm1, %v1083_v5 }
 0x818   :  { %1211 = vmatprep.mubr.msk.bf16.mxu1 %vm1288_vm0, %v1287_v1  ;;  %1208 = vmatpush3.bf16.msra.mxu1 %v1235_v57 }
 0x819   :  { %1209 = vmatprep.subr.bf16.mxu1 %v1287_v1 }
 0x81c   :  { %1210 = vmatpush3.bf16.msra.mxu1 %v1236_v10 }
 0x8d7   :  { %v820_v8 = vpop.f32.mrf.mxu1 }
 0x8d8   :  { %v821_v11 = vadd.f32 %v820_v8, %v1501_v53 }
 0x8d9   :  { %v1193_v12 = vpop.f32.mrf.mxu1 }
 0x8da   :  { %v829_v13 = vmul.f32 0.044715, %v821_v11  ;;  %v827_v31 = vmul.f32 0.5, %v821_v11 }
 0x8db   :  { %v823_v15 = vpop.f32.mrf.mxu1 }
 0x8dc   :  { %v831_v16 = vmul.f32 %v829_v13, %v821_v11  ;;  %v824_v17 = vadd.f32 %v823_v15, %v1501_v53 }
 0x8dd   :  { %v1194_v19 = vpop.f32.mrf.mxu1 }
 0x8de   :  { %v833_v20 = vmul.f32 %v831_v16, %v821_v11  ;;  %v830_v21 = vmul.f32 0.044715, %v824_v17  ;;  %v828_v32 = vmul.f32 0.5, %v824_v17  ;;  %v1296_v19 = vmov 0  }
 0x8df   :  { %1226 = vset.pattern.permute.xlu0 %v1296_v19 }
 0x8e0   :  { %v835_v22 = vadd.f32 %v833_v20, %v821_v11  ;;  %v832_v23 = vmul.f32 %v830_v21, %v824_v17 }
 0x8e2   :  { %v837_v24 = vmul.f32 0.7978846, %v835_v22  ;;  %v834_v25 = vmul.f32 %v832_v23, %v824_v17 }
 0x8e4   :  { %1257 = vtanh.f32 %v837_v24  ;;  %v836_v26 = vadd.f32 %v834_v25, %v824_v17 }
 0x8e6   :  { %v838_v27 = vmul.f32 0.7978846, %v836_v26 }
 0x8e8   :  { %1259 = vtanh.f32 %v838_v27 }
 0x8f1   :  { %v1258_v28 = vpop.eup %1257 }
 0x8f2   :  { %v841_v29 = vadd.f32 1.0, %v1258_v28 }
 0x8f4   :  { %v843_v35 = vmul.f32 %v841_v29, %v827_v31 }
 0x8f5   :  { %v1260_v30 = vpop.eup %1259 }
 0x8f6   :  { %v842_v33 = vadd.f32 1.0, %v1260_v30 }
 0x8f8   :  { %v844_v36 = vmul.f32 %v842_v33, %v828_v32 }
 0x8fa   :  { %v1084_v37 = vpack.c.bf16 %v844_v36, %v843_v35 }
 0x8fc   :  { %1204 = vmatmul.mubr.msk.bf16.vlgmr.msra.gmra.mxu0 %vm880_vm5, %v1084_v37 }
 0x9bc   :  { %v918_v39 = vpop.f32.mrf.mxu0 }
 0x9bd   :  { %v919_v41 = vadd.f32 %v918_v39, %v878_v38 }
 0x9be   :  { %v1205_v42 = vpop.f32.mrf.mxu0 }
 0x9bf   :  { %v925_v43 = vadd.f32 %v919_v41, %v758_v62 }
 0x9c0   :  { %v921_v44 = vpop.f32.mrf.mxu0 }
 0x9c1   :  { %v922_v45 = vadd.f32 %v921_v44, %v878_v38  ;;  %v927_v46 = vsel %vm97_vm1, %v925_v43, 0.0 }
 0x9c2   :  { %928 = vadd.xlane.f32.xlu0 %v927_v46  ;;  %v1206_v47 = vpop.f32.mrf.mxu0 }
 0x9c3   :  { %v926_v48 = vadd.f32 %v922_v45, %v759_v63 }
 0x9c5   :  { %v930_v3 = vsel %vm97_vm1, %v926_v48, 0.0 }
 0x9c6   :  { %931 = vadd.xlane.f32.xlu1 %v930_v3 }
 0xa4b   :  { %v929_v49 = vpop.xlane.xlu0 %928 }
 0xa4c   :  { %v933_v34 = vmul.f32 0.03125, %v929_v49 }
 0xa4e   :  { %v935_v50 = vsub.f32 %v925_v43, %v933_v34 }
 0xa4f   :  { %v932_v51 = vpop.xlane.xlu1 %931 }
 0xa50   :  { %v934_v52 = vmul.f32 0.03125, %v932_v51  ;;  %v937_v54 = vmul.f32 %v935_v50, %v935_v50 }
 0xa52   :  { %v936_v40 = vsub.f32 %v926_v48, %v934_v52  ;;  %v939_v55 = vsel %vm97_vm1, %v937_v54, 0.0 }
 0xa53   :  { %940 = vadd.xlane.f32.xlu1 %v939_v55 }
 0xa54   :  { %v938_v56 = vmul.f32 %v936_v40, %v936_v40 }
 0xa56   :  { %v942_v18 = vsel %vm97_vm1, %v938_v56, 0.0 }
 0xa57   :  { %943 = vadd.xlane.f32.xlu0 %v942_v18 }
 0xa64   :  { %958 = vrot.lane.b32.xlu1 %v1487_v4, %s1295_s6 }
 0xa68   :  { %985 = vrot.lane.b32.xlu1 %v1501_v53, %s1295_s6 }
 0xa6d   :  { %953 = vrot.lane.b32.xlu0 %v1487_v4, %s1291_s1 }
 0xadc   :  { %v941_v58 = vpop.xlane.xlu1 %940 }
 0xadd   :  { %v945_v59 = vmul.f32 0.03125, %v941_v58 }
 0xadf   :  { %v947_v60 = vadd.f32 1e-05, %v945_v59 }
 0xae0   :  { %v944_v7 = vpop.xlane.xlu0 %943  ;;  %v959_v14 = vpop.permute.xlu1 %958 }
 0xae1   :  { %1261 = vrsqrt.f32 %v947_v60  ;;  %v946_v53 = vmul.f32 0.03125, %v944_v7 }
 0xae3   :  { %v948_v61 = vadd.f32 1e-05, %v946_v53 }
 0xae4   :  { %v954_v9 = vpop.permute.xlu0 %953  ;;  %v986_v20 = vpop.permute.xlu1 %985 }
 0xae5   :  { %1263 = vrsqrt.f32 %v948_v61 }
 0xaee   :  { %v1262_v4 = vpop.eup %1261 }
 0xaef   :  { %v951_v62 = vmul.f32 %v1262_v4, %v935_v50 }
 0xaf1   :  { %v956_v63 = vmul.f32 %v954_v9, %v951_v62 }
 0xaf2   :  { %v1264_v5 = vpop.eup %1263 }
 0xaf3   :  { %v952_v1 = vmul.f32 %v1264_v5, %v936_v40  ;;  %v961_v0 = vadd.f32 %v959_v14, %v956_v63 }
 0xaf5   :  { %v957_v6 = vmul.f32 %v954_v9, %v952_v1  ;;  %v963_v8 = vpack.c.bf16 %v961_v0, %v961_v0 }
 0xaf7   :  { %v962_v2 = vadd.f32 %v959_v14, %v957_v6  ;;  %v967_v13 = vunpack.c.l.b16 %v963_v8 }
 0xaf9   :  { %v964_v11 = vpack.c.bf16 %v962_v2, %v962_v2 }
 0xafb   :  { %v968_v12 = vunpack.c.l.b16 %v964_v11 }
 0xafd   :  { %v969_v15 = vrot.slane %v968_v12, 7 }
 0xaff   :  { %v971_v16 = vsel %vm970_vm6, %v969_v15, %v967_v13 }
 0xb00   :  { %v972_v17 = vpack.c.b16 %v971_v16, %v971_v16 }
 0xb02   :  { %1212 = vmatmul.mubr.msk.bf16.vlgmr.msra.gmra.mxu1 %vm97_vm1, %v972_v17 }
 0xbc2   :  { %v1025_v21 = vpop.f32.mrf.mxu1 }
 0xbc3   :  { %v1026_v22 = vadd.f32 %v1025_v21, %v986_v20 }
 0xbc4   :  { %v1213_v23 = vpop.f32.mrf.mxu1 }
 0xbc5   :  { %1033 = vperm.xlu0 %1226, %v1026_v22  }
 0xbc6   :  { %v1028_v24 = vpop.f32.mrf.mxu1 }
 0xbc8   :  { %v1214_v25 = vpop.f32.mrf.mxu1 }
 0xc40   :  { %v1034_v26 = vpop.permute.xlu0 %1033 }
 0xc41   :  { %1036 = vst [vmem:[#allocation2] sm:$0x3] %v1034_v26 }
 0xc42   :  { %1276 = shalt.err (!%p1273_p4)
}
 0xc43   :  { %1046 = dma.vmem_to_hbm [thread:$0]  %s1044_s23, 32, %s1553_s5, [#allocation3]  }
 0xc44   :  { %1285 = dma.done.wait [#allocation3], 32  }
 0xc45   :  { %1286 = vsyncadd [#allocation3], 4294967264 }
 0xc46   :  { %1050 = vsyncpa [#allocation3], 1 }

</bundles_post_ra>
